<compile_context>
chip_gen: v6e
topology: v6e:2x2x1
jax: 0.10.0
libtpu: 0.0.40
codegen_flags: <defaults>
</compile_context>

<pallas_src>
import jax
import jax.numpy as jnp
from jax.experimental import pallas as pl
from jax.experimental.pallas import tpu as pltpu


def _pick_tile(dim, target, quantum):
    """Largest tile <= target that divides `dim` and is a multiple of `quantum`
    (falls back to the full dim, which always satisfies the layout rule)."""
    if dim <= target:
        return dim
    t = (target // quantum) * quantum
    while t >= quantum:
        if dim % t == 0:
            return t
        t -= quantum
    return dim


def _multiway_linear_kernel(x_ref, w_ref, b_ref, o_ref, acc_ref):
    # x_ref: (TM, TK)   w_ref: (TK, TN)  (already H_in-major)
    # b_ref: (1, TN)    o_ref: (TM, TN)  acc_ref: (TM, TN) f32 scratch
    k = pl.program_id(4)

    @pl.when(k == 0)
    def _():
        acc_ref[...] = jnp.zeros_like(acc_ref)

    acc_ref[...] += jnp.dot(x_ref[...], w_ref[...],
                            preferred_element_type=jnp.float32)

    @pl.when(k == pl.num_programs(4) - 1)
    def _():
        # Bias added exactly once per output tile, in f32, cast once at store.
        o_ref[...] = (acc_ref[...] + b_ref[...].astype(jnp.float32)
                      ).astype(o_ref.dtype)


def multiway_forward(x, weights, biases, *,
                     tm_target=256, tn_target=512, tk_target=512):
    """MultiwayNetwork(nn.Linear) forward.

    x:       [B, S, H_in]      (split along S into C equal chunks)
    weights: [C, H_out, H_in]  (PyTorch Linear convention, one per way)
    biases:  [C, H_out]
    returns: [B, S, H_out]
    """
    B, S, H_in = x.shape
    C, H_out, H_in_w = weights.shape
    assert H_in_w == H_in
    assert S % C == 0, "sequence length must divide evenly by num_channels"
    Sc = S // C

    TM = _pick_tile(Sc, tm_target, 8)
    TK = _pick_tile(H_in, tk_target, 128)
    TN = _pick_tile(H_out, tn_target, 128)
    assert Sc % TM == 0
    assert (TM % 8 == 0) or (TM == S), "per-way row chunk must be 8-aligned"

    m_tiles = Sc // TM
    n_tiles = H_out // TN
    k_tiles = H_in // TK

    # One-time weight relayout [C, H_out, H_in] -> [C, H_in, H_out]: contract on
    # x's last dim against w's first dim, so the MXU is fed directly and no
    # per-grid-step transpose happens inside the kernel.
    w_t = jnp.transpose(weights, (0, 2, 1))
    b3 = biases.reshape(C, 1, H_out)

    cost = pl.CostEstimate(
        flops=2 * B * S * H_in * H_out,
        transcendentals=0,
        bytes_accessed=(x.size * x.dtype.itemsize
                        + w_t.size * w_t.dtype.itemsize
                        + b3.size * b3.dtype.itemsize
                        + B * S * H_out * x.dtype.itemsize),
    )

    grid = (C, B, m_tiles, n_tiles, k_tiles)   # reduction axis innermost

    out = pl.pallas_call(
        _multiway_linear_kernel,
        out_shape=jax.ShapeDtypeStruct((B, S, H_out), x.dtype),
        grid=grid,
        in_specs=[
            # x indexed directly in the original [B, S, H] layout; the row
            # block c*m_tiles + m is exactly this way's chunk slice.
            pl.BlockSpec((None, TM, TK),
                         lambda c, b, m, n, k: (b, c * m_tiles + m, k)),
            # Per-way weight tile.
            pl.BlockSpec((None, TK, TN),
                         lambda c, b, m, n, k: (c, k, n)),
            # Per-way bias tile (only changes with c / n).
            pl.BlockSpec((None, 1, TN),
                         lambda c, b, m, n, k: (c, 0, n)),
        ],
        out_specs=pl.BlockSpec((None, TM, TN),
                               lambda c, b, m, n, k: (b, c * m_tiles + m, n)),
        scratch_shapes=[pltpu.VMEM((TM, TN), jnp.float32)],
        compiler_params=pltpu.CompilerParams(
            dimension_semantics=("parallel", "parallel", "parallel",
                                 "parallel", "arbitrary")),
        cost_estimate=cost,
    )(x, w_t, b3)
    return out


def _reference(x, weights, biases):
    B, S, H_in = x.shape
    C, H_out, _ = weights.shape
    Sc = S // C
    chunks = []
    for c in range(C):
        xc = x[:, c * Sc:(c + 1) * Sc, :]
        yc = jnp.einsum("bsh,oh->bso", xc, weights[c]) + biases[c]
        chunks.append(yc)
    return jnp.concatenate(chunks, axis=1)


if __name__ == "__main__":
    # Small shapes: batch=2, seq=16, hidden=32, num_channels=2 (chunk Sc=8,
    # which keeps the row tile sublane-aligned).
    # TODO(synk): the original module deep-copies an arbitrary inner module;
    # this kernel implements the nn.Linear case.
    B, S, H = 2, 16, 32
    C = 2

    key = jax.random.PRNGKey(0)
    kx, kw, kb = jax.random.split(key, 3)
    x = jax.random.normal(kx, (B, S, H), dtype=jnp.float32)
    # Deterministic per-way Linear params (PyTorch-style uniform init range).
    bound = 1.0 / (H ** 0.5)
    weights = jax.random.uniform(kw, (C, H, H), minval=-bound, maxval=bound,
                                 dtype=jnp.float32)
    biases = jax.random.uniform(kb, (C, H), minval=-bound, maxval=bound,
                                dtype=jnp.float32)

    y = multiway_forward(x, weights, biases)
    y = jax.block_until_ready(y)

    y_ref = _reference(x, weights, biases)
    assert y.shape == (B, S, H), y.shape
    assert jnp.allclose(y, y_ref, atol=1e-5, rtol=1e-5), "mismatch vs reference"

    print("KERNEL_OK")
</pallas_src>

<mosaic_0001>
module attributes {stable_mosaic.version = 11 : i64} {
  func.func @_multiway_linear_kernel(%arg0: i32, %arg1: i32, %arg2: i32, %arg3: i32, %arg4: i32, %arg5: memref<1x8x32xf32, #tpu.memory_space<vmem>>, %arg6: memref<1x32x32xf32, #tpu.memory_space<vmem>>, %arg7: memref<1x1x32xf32, #tpu.memory_space<vmem>>, %arg8: memref<1x8x32xf32, #tpu.memory_space<vmem>>, %arg9: memref<8x32xf32, #tpu.memory_space<vmem>>) attributes {dimension_semantics = [#tpu.dimension_semantics<parallel>, #tpu.dimension_semantics<parallel>, #tpu.dimension_semantics<parallel>, #tpu.dimension_semantics<parallel>, #tpu.dimension_semantics<arbitrary>], iteration_bounds = array<i64: 2, 2, 1, 1, 1>, scalar_prefetch = 0 : i64, scratch_operands = 1 : i64, tpu.core_type = #tpu.core_type<tc>, window_params = [{transform_indices = @transform_0, window_bounds = array<i64: 1, 8, 32>}, {transform_indices = @transform_1, window_bounds = array<i64: 1, 32, 32>}, {transform_indices = @transform_2, window_bounds = array<i64: 1, 1, 32>}, {transform_indices = @transform_3, window_bounds = array<i64: 1, 8, 32>}]} {
    %c0_i32 = arith.constant 0 : i32
    %0 = arith.cmpi eq, %arg4, %c0_i32 : i32
    %1 = arith.extui %0 : i1 to i32
    %c0_i32_0 = arith.constant 0 : i32
    %2 = arith.cmpi ne, %1, %c0_i32_0 : i32
    scf.if %2 {
      %cst_12 = arith.constant 0.000000e+00 : f32
      %14 = vector.broadcast %cst_12 : f32 to vector<8x32xf32>
      %c0_13 = arith.constant 0 : index
      %c0_14 = arith.constant 0 : index
      %15 = vector.load %arg9[%c0_13, %c0_14] : memref<8x32xf32, #tpu.memory_space<vmem>>, vector<8x32xf32>
      tpu.vector_store %arg9[%c0_13, %c0_14], %14 {strides = array<i32>} : memref<8x32xf32, #tpu.memory_space<vmem>>, vector<8x32xf32>,
    } else {
    }
    %c0 = arith.constant 0 : index
    %c0_1 = arith.constant 0 : index
    %3 = vector.load %arg9[%c0, %c0_1] : memref<8x32xf32, #tpu.memory_space<vmem>>, vector<8x32xf32>
    %c0_2 = arith.constant 0 : index
    %c0_3 = arith.constant 0 : index
    %c0_4 = arith.constant 0 : index
    %4 = vector.load %arg5[%c0_2, %c0_3, %c0_4] : memref<1x8x32xf32, #tpu.memory_space<vmem>>, vector<1x8x32xf32>
    %5 = vector.shape_cast %4 : vector<1x8x32xf32> to vector<8x32xf32>
    %c0_5 = arith.constant 0 : index
    %c0_6 = arith.constant 0 : index
    %c0_7 = arith.constant 0 : index
    %6 = vector.load %arg6[%c0_5, %c0_6, %c0_7] : memref<1x32x32xf32, #tpu.memory_space<vmem>>, vector<1x32x32xf32>
    %7 = vector.shape_cast %6 : vector<1x32x32xf32> to vector<32x32xf32>
    %cst = arith.constant dense<0.000000e+00> : vector<8x32xf32>
    %8 = tpu.matmul %5, %7, %cst {dimension_numbers = #tpu.dot_dimension_numbers<[1], [0], [0], [1], [0, 0, 1, 1], [], []>} : vector<8x32xf32>, vector<32x32xf32>, vector<8x32xf32> -> vector<8x32xf32>
    %9 = arith.addf %3, %8 : vector<8x32xf32>
    %c0_8 = arith.constant 0 : index
    %c0_9 = arith.constant 0 : index
    %10 = vector.load %arg9[%c0_8, %c0_9] : memref<8x32xf32, #tpu.memory_space<vmem>>, vector<8x32xf32>
    tpu.vector_store %arg9[%c0_8, %c0_9], %9 {strides = array<i32>} : memref<8x32xf32, #tpu.memory_space<vmem>>, vector<8x32xf32>,
    %c0_i32_10 = arith.constant 0 : i32
    %11 = arith.cmpi eq, %arg4, %c0_i32_10 : i32
    %12 = arith.extui %11 : i1 to i32
    %c0_i32_11 = arith.constant 0 : i32
    %13 = arith.cmpi ne, %12, %c0_i32_11 : i32
    scf.if %13 {
      %c0_12 = arith.constant 0 : index
      %c0_13 = arith.constant 0 : index
      %14 = vector.load %arg9[%c0_12, %c0_13] : memref<8x32xf32, #tpu.memory_space<vmem>>, vector<8x32xf32>
      %c0_14 = arith.constant 0 : index
      %c0_15 = arith.constant 0 : index
      %c0_16 = arith.constant 0 : index
      %15 = vector.load %arg7[%c0_14, %c0_15, %c0_16] : memref<1x1x32xf32, #tpu.memory_space<vmem>>, vector<1x1x32xf32>
      %16 = vector.shape_cast %15 : vector<1x1x32xf32> to vector<1x32xf32>
      %17 = vector.broadcast %16 : vector<1x32xf32> to vector<8x32xf32>
      %18 = arith.addf %14, %17 : vector<8x32xf32>
      %c0_17 = arith.constant 0 : index
      %c0_18 = arith.constant 0 : index
      %c0_19 = arith.constant 0 : index
      %19 = vector.load %arg8[%c0_17, %c0_18, %c0_19] : memref<1x8x32xf32, #tpu.memory_space<vmem>>, vector<1x8x32xf32>
      %20 = vector.shape_cast %19 : vector<1x8x32xf32> to vector<8x32xf32>
      %21 = vector.shape_cast %18 : vector<8x32xf32> to vector<1x8x32xf32>
      tpu.vector_store %arg8[%c0_17, %c0_18, %c0_19], %21 {strides = array<i32>} : memref<1x8x32xf32, #tpu.memory_space<vmem>>, vector<1x8x32xf32>,
    } else {
    }
    return
  }
  func.func @transform_0(%arg0: i32, %arg1: i32, %arg2: i32, %arg3: i32, %arg4: i32) -> (i32, i32, i32) {
    %c1_i32 = arith.constant 1 : i32
    %0 = arith.muli %arg0, %c1_i32 : i32
    %1 = arith.addi %0, %arg2 : i32
    %c0_i32 = arith.constant 0 : i32
    return %arg1, %1, %arg4 : i32, i32, i32
  }
  func.func @transform_1(%arg0: i32, %arg1: i32, %arg2: i32, %arg3: i32, %arg4: i32) -> (i32, i32, i32) {
    %c0_i32 = arith.constant 0 : i32
    return %arg0, %arg4, %arg3 : i32, i32, i32
  }
  func.func @transform_2(%arg0: i32, %arg1: i32, %arg2: i32, %arg3: i32, %arg4: i32) -> (i32, i32, i32) {
    %c0_i32 = arith.constant 0 : i32
    %c0_i32_0 = arith.constant 0 : i32
    return %arg0, %c0_i32, %arg3 : i32, i32, i32
  }
  func.func @transform_3(%arg0: i32, %arg1: i32, %arg2: i32, %arg3: i32, %arg4: i32) -> (i32, i32, i32) {
    %c1_i32 = arith.constant 1 : i32
    %0 = arith.muli %arg0, %c1_i32 : i32
    %1 = arith.addi %0, %arg2 : i32
    %c0_i32 = arith.constant 0 : i32
    return %arg1, %1, %arg3 : i32, i32, i32
  }
}

</mosaic_0001>

<bundles_post_ra>
// kernel: tpu_custom_call.1
= control target key start
LH: loop header
LB: loop body
LE: loop exit
PB: predicated region body
PF: predicated region fallthrough
CT: control target
= control target key end

     0   :  { %s1183_s0 = inlined_call_operand.hbm [shape: f32[2,16,32], index: 0, kind: input, shape index: {}]   ;;  %s1184_s1 = inlined_call_operand.hbm [shape: f32[2,32,32], index: 1, kind: input, shape index: {}]   ;;  %s1185_s2 = inlined_call_operand.vmem [shape: f32[2,1,32], index: 2, kind: input, shape index: {}]   ;;  %s1186_s3 = inlined_call_operand.hbm [shape: f32[2,16,32], index: 3, kind: output, shape index: {}]  }
   0x1   :  { %1192 = sst [smem:[#allocation17_spill]] %s1183_s0 }
   0x2   :  { %8 = vsyncpa [#allocation4], 0 }
   0x3   :  { %10 = vsyncpa [#allocation4 + $0x1], 0 }
   0x4   :  { %11 = vsyncpa [#allocation7], 0 }
   0x5   :  { %13 = vsyncpa [#allocation7 + $0x1], 0 }
   0x6   :  { %14 = vsyncpa [#allocation5], 0 }
   0x7   :  { %16 = vsyncpa [#allocation5 + $0x1], 0  ;;  %s924_s12 = smov 0   ;;  %s926_s13 = smov 0  }
   0x8   :  { %s928_s14 = smov 0   ;;  %s930_s15 = smov 0  }
   0x9   :  { %s932_s16 = smov 0   ;;  %s934_s17 = smov 0  }
   0xa   :  { %s936_s18 = smov 0   ;;  %s938_s19 = smov 0  }
   0xb   :  { %s940_s20 = smov 0   ;;  %s942_s21 = smov 0  }
   0xc   :  { %s944_s22 = smov 0  }
   0xd LB: > { %1193 = sst [smem:[#allocation12_spill]] %s875_s17  ;;  %s566_s23 = sadd.s32 4294967295, %s895_s22   ;;  %s895_s22 = sphi %s944_s22, %s22_s22   ;;  %s891_s21 = sphi %s942_s21, %s1225_s21   ;;  %s887_s20 = sphi %s940_s20, %s1224_s20   ;;  %s883_s19 = sphi %s938_s19, %s1223_s19   ;;  %s879_s18 = sphi %s936_s18, %s1222_s18   ;;  %s875_s17 = sphi %s934_s17, %s1214_s17   ;;  %s871_s16 = sphi %s932_s16, %s1221_s16   ;;  %s867_s15 = sphi %s930_s15, %s1220_s15   ;;  %s863_s14 = sphi %s928_s14, %s1219_s14   ;;  %s859_s13 = sphi %s926_s13, %s1218_s13   ;;  %s855_s12 = sphi %s924_s12, %s1217_s12  }
   0xe   : > { %s567_s24 = sadd.s32 4294967294, %s895_s22   ;;  %s51_s25 = sadd.s32 1, %s887_s20 }
   0xf   : > { %s55_s26 = sadd.s32 1, %s891_s21  ;;  %p53_p0 = scmp.ge.s32.totalorder %s51_s25, 2 }
  0x10   : > { %s68_s27 = sadd.s32 1, %s875_s17  ;;  %p75_p1 = scmp.ne.s32.totalorder %s875_s17, %s871_s16 }
  0x11   : > { %p76_p2 = scmp.eq.s32.totalorder %s895_s22, 0  ;;  %s1227_s25 = smov (%p53_p0, %s51_s25), 0 }
  0x12   : > { %1194 = sst [smem:[#allocation13_spill]] %s1227_s25  ;;  %s1229_s26 = smov (!%p53_p0, %s55_s26), %s891_s21 }
  0x13   : > { %s61_s28 = ssub.s32 %s887_s20, %s1227_s25  ;;  %p997_p3 = por %p76_p2, %p75_p1 }
  0x14   : > { %p57_p4 = scmp.ge.s32.totalorder %s1229_s26, 2  ;;  %p81_p5 = scmp.ne.s32.totalorder %s871_s16, %s867_s15 }
  0x15   : > { %p1003_p6 = scmp.eq.s32.totalorder %s566_s23, 0  ;;  %s98_s4 = sadd.s32 1, %s863_s14 }
  0x16   : > { %s1231_s26 = smov (%p57_p4, %s1229_s26), 0  ;;  %p105_p8 = scmp.ne.s32.totalorder %s863_s14, %s859_s13 }
  0x17   : > { %1197 = sst [smem:[#allocation14_spill]] %s1231_s26  ;;  %p1015_p7 = por %p1003_p6, %p81_p5 }
  0x18   : > { %s62_s6 = ssub.s32 %s891_s21, %s1231_s26  ;;  %p111_p9 = scmp.ne.s32.totalorder %s859_s13, %s855_s12 }
  0x19   : > { %s63_s7 = sor.u32 %s62_s6, %s61_s28  ;;  %p96_p10 = scmp.eq.s32.totalorder %s62_s6, 0 }
  0x1a   : > { %p66_p11 = scmp.eq.s32.totalorder %s63_s7, 0  ;;  %p1027_p12 = por %p105_p8, %p76_p2 }
  0x1b   : > { %s1032_s9 = scalar_select %p96_p10, %s863_s14, %s98_s4  }
  0x1c   : > { %s1035_s10 = scalar_select %p66_p11, %s875_s17, %s68_s27  }
  0x1d   : > { %1200 = sst [smem:[#allocation15_spill]] %s1032_s9  ;;  %p1039_p13 = por %p111_p9, %p1003_p6 }
  0x1e   : > { %1201 = sst [smem:[#allocation16_spill]] %s1035_s10  ;;  %p169_p0 = scmp.eq.s32.totalorder %s566_s23, 3 }
  0x1f   : > { %s1202_s11 = scalar_select %p1039_p13, 1, 0 }
  0x20   : > { %p175_p4 = scmp.eq.s32.totalorder %s567_s24, 3  ;;  %p1046_p2 = por %p169_p0, %p75_p1 }
  0x21   : > { %p621_p8 = scmp.lt.s32.totalorder %s895_s22, 4  ;;  %s195_s28 = sand.u32 1, %s875_s17  }
  0x22   : > { %s1203_s12 = scalar_select %p1046_p2, 1, 0 }
  0x23   : > { %p1054_p10 = por %p175_p4, %p81_p5  ;;  %s570_s30 = sshll.u32 %s195_s28, 3 }
  0x24   : > { %s571_s4 = sshll.u32 %s887_s20, 1  ;;  %s199_s7 = scalar_lea.vmem [#allocation3], %s570_s30 }
  0x25   : > { %s1204_s27 = scalar_select %p1054_p10, 1, 0 }
  0x26   : > { %s206_s6 = sadd.s32 %s891_s21, %s571_s4  ;;  %s210_s23 = sshll.u32 %s199_s7, 4  ;;  %s211_s23 = int_to_ptr.vmem [resolvable:$true] %s210_s23 }
  0x27   : > { %s572_s26 = sshll.u32 %s206_s6, 7  ;;  %s1205_s0 = sld [smem:[#allocation17_spill]] }
  0x28   : > { %p1066_p1 = pnand %p621_p8, %p997_p3  ;;  %p1072_p5 = pnand %p621_p8, %p1027_p12 }
  0x29   : > { %p576_p6 = scmp.ge.s32.totalorder %s895_s22, 1  ;;  %p248_p9 = scmp.lt.s32.totalorder %s895_s22, 5 }
  0x2a   : > { %s196_s30 = scalar_lea.sflag [#allocation4], %s195_s28  ;;  %p717_p11 = pneg %p1066_p1 }
  0x2b   : > { %s728_s4 = scalar_lea.vmem %s211_s23, 128  ;;  %s897_s25 = smov [#allocation3]  }
  0x2c   : > { %p729_p0 = scmp.ne.s32.totalorder %s211_s23, %s728_s4 }
  0x2d   : > { %s208_s10 = scalar_lea.hbm %s1205_s0, %s572_s26  ;;  %s733_s26 = sshll.u32 %s897_s25, 4  ;;  %s734_s26 = int_to_ptr.vmem [resolvable:$false] %s733_s26 }
  0x2e   : > { %p731_p4 = pnand %p729_p0, %p717_p11  ;;  %s735_s29 = scalar_lea.vmem %s734_s26, 256 }
  0x2f   : > { %p736_p3 = scmp.lt.s32.totalorder %s211_s23, %s734_s26  ;;  %p737_p2 = scmp.lt.s32.totalorder %s735_s29, %s728_s4 }
  0x30   : > { %p732_p10 = pneg %p731_p4 }
  0x31   : > { %p738_p13 = por %p737_p2, %p736_p3 }
  0x33   : > { %p739_p12 = pnand %p738_p13, %p732_p10 }
  0x35   : > { %742 = shalt.err (!%p739_p12)
}
  0x36   : > { %613 = dma.hbm_to_vmem [thread:$0]  (!%p1066_p1), %s208_s10, 128, %s211_s23, %s196_s30  }
  0x37   : > { %p1086_p8 = pnand %p576_p6, %p248_p9  ;;  %s217_s28 = sand.u32 1, %s863_s14  }
  0x38   : > { %s587_s6 = sshll.u32 %s891_s21, 9  ;;  %s573_s7 = sshll.u32 %s217_s28, 5 }
  0x39   : > { %s230_s25 = scalar_lea.hbm %s1184_s1, %s587_s6  ;;  %s221_s9 = scalar_lea.vmem [#allocation6], %s573_s7 }
  0x3a   : > { %s231_s26 = sshll.u32 %s221_s9, 4  ;;  %s218_s29 = scalar_lea.sflag [#allocation7], %s217_s28  ;;  %s232_s26 = int_to_ptr.vmem [resolvable:$true] %s231_s26 }
  0x3b   : > { %p745_p13 = pneg %p1072_p5  ;;  %s756_s10 = scalar_lea.vmem %s232_s26, 512 }
  0x3c   : > { %p757_p2 = scmp.ne.s32.totalorder %s232_s26, %s756_s10  ;;  %s898_s23 = smov [#allocation6]  }
  0x3d   : > { %s761_s30 = sshll.u32 %s898_s23, 4  ;;  %s762_s30 = int_to_ptr.vmem [resolvable:$false] %s761_s30 }
  0x3e   : > { %p759_p10 = pnand %p757_p2, %p745_p13  ;;  %s763_s0 = scalar_lea.vmem %s762_s30, 1024 }
  0x3f   : > { %p764_p6 = scmp.lt.s32.totalorder %s232_s26, %s762_s30  ;;  %p765_p9 = scmp.lt.s32.totalorder %s763_s0, %s756_s10 }
  0x40   : > { %p760_p1 = pneg %p759_p10 }
  0x41   : > { %p766_p11 = por %p765_p9, %p764_p6 }
  0x43   : > { %p767_p0 = pnand %p766_p11, %p760_p1 }
  0x45   : > { %770 = shalt.err (!%p767_p0)
}
  0x46   : > { %s899_s6 = smov 128   ;;  %s900_s7 = smov 8  }
  0x47   : > { %616 = dma.hbm_to_vmem [thread:$0]  (!%p1072_p5), %s230_s25, 512, %s232_s26, %s218_s29, %s899_s6, %s899_s6, %s900_s7  }
  0x48   : > { %252 = sbr.rel (%p1086_p8) target bundleno = 309 (0x135), region = 32  ;;  %s1102_s28 = sand.u32 (!%p1086_p8), 1, %s871_s16  }
  0x49   : > { %s577_s24 = sshll.u32 (!%p1086_p8), %s1102_s28, 3  ;;  %s255_s0 = scalar_lea.sflag (!%p1086_p8), [#allocation4], %s1102_s28 }
  0x4a   : > { %s258_s4 = scalar_lea.vmem (!%p1086_p8), [#allocation3], %s577_s24 }
  0x4d   : > { %842 = dma.done.wait (%p1015_p7), %s255_s0, 128  }
  0x4e   : > { %844 = vsyncadd (%p1015_p7), %s255_s0, 4294967168  ;;  %s263_s17 = sand.u32 1, %s859_s13   ;;  %p1209_p5 = scmp.ne.s32.totalorder %s1202_s11, 0 }
  0x4f   : > { %s578_s8 = sshll.u32 %s263_s17, 5  ;;  %s264_s25 = scalar_lea.sflag [#allocation7], %s263_s17 }
  0x50   : > { %s267_s9 = scalar_lea.vmem [#allocation6], %s578_s8 }
  0x51   : > { %846 = dma.done.wait (%p1209_p5), %s264_s25, 512  }
  0x52   : > { %848 = vsyncadd (%p1209_p5), %s264_s25, 4294966784  ;;  %vm314_vm0 = vcmask 261120   ;;  %v901_v0 = vmov 0.0   ;;  %vm902_vm1 = vmmov 0   ;;  %v321_v1 = vld [vmem:[%s267_s9 + $0x18] sm:$0xff]  ;;  %v320_v2 = vld [vmem:[%s267_s9 + $0x10] sm:$0xff] }
  0x53   : > { %593 = vmatprep.subr.mxu0 %v901_v0  ;;  %601 = vmatprep.mubr.msk.f32.mxu0 %vm902_vm1, %v901_v0  ;;  %315 = vst.msk [vmem:[#allocation2] sm:$0xff] %vm314_vm0, %v901_v0  ;;  %v319_v3 = vld [vmem:[%s267_s9 + $0x8] sm:$0xff]  ;;  %v318_v4 = vld [vmem:[%s267_s9] sm:$0xff]  ;;  %v317_v5 = vld [vmem:[%s258_s4] sm:$0xff]  ;;  %p303_p7 = scmp.lt.s32.totalorder %s883_s19, 1  ;;  %s583_s11 = sshll.u32 %s879_s18, 1 }
  0x54   : > { %594 = vmatpush3.msra.mxu0 %v321_v1  ;;  %s425_s23 = sadd.s32 %s883_s19, %s583_s11  ;;  %s300_s6 = scalar_lea.vmem [#allocation8], %s577_s24 }
  0x55   : > { %595 = vmatprep.subr.mxu0 %v901_v0  ;;  %s304_s5 = scalar_select %p303_p7, %s883_s19, 1 }
  0x56   : > { %596 = vmatpush3.msra.mxu0 %v320_v2  ;;  %s584_s30 = sshll.u32 %s425_s23, 7  ;;  %s429_s7 = sshll.u32 %s300_s6, 4  ;;  %s430_s7 = int_to_ptr.vmem [resolvable:$true] %s429_s7 }
  0x57   : > { %597 = vmatprep.subr.mxu0 %v901_v0  ;;  %s308_s10 = scalar_lea.vmem %s1185_s2, %s304_s5  ;;  %s427_s17 = scalar_lea.hbm %s1186_s3, %s584_s30 }
  0x58   : > { %598 = vmatpush3.msra.mxu0 %v319_v3  ;;  %v581_v10 = vld [vmem:[%s308_s10] ss:$0 sm:$0xff]  ;;  %s412_s18 = scalar_lea.sflag [#allocation5], %s1102_s28  ;;  %s771_s8 = scalar_lea.vmem %s430_s7, 128 }
  0x59   : > { %599 = vmatprep.subr.mxu0 %v901_v0  ;;  %p772_p4 = scmp.ne.s32.totalorder %s430_s7, %s771_s8  ;;  %p1210_p3 = scmp.ne.s32.totalorder %s1203_s12, 0 }
  0x5a   : > { %600 = vmatpush3.msra.mxu0 %v318_v4  ;;  %v316_v6 = vld [vmem:[#allocation2] sm:$0xff]  ;;  %s903_s19 = smov [#allocation8]  }
  0x5b   : > { %602 = vmatmul.mubr.msk.f32.vlgmr.msra.gmra.mxu0 %vm314_vm0, %v317_v5  ;;  %p773_p12 = pnand %p772_p4, %p1210_p3  ;;  %s775_s25 = sshll.u32 %s903_s19, 4  ;;  %s776_s25 = int_to_ptr.vmem [resolvable:$false] %s775_s25 }
  0x5c   : > { %s777_s24 = scalar_lea.vmem %s776_s25, 256  ;;  %p778_p13 = scmp.lt.s32.totalorder %s430_s7, %s776_s25 }
  0x5d   : > { %p774_p8 = pneg %p773_p12  ;;  %p779_p2 = scmp.lt.s32.totalorder %s777_s24, %s771_s8 }
  0x5f   : > { %p780_p10 = por %p779_p2, %p778_p13 }
  0x61   : > { %p781_p1 = pnand %p780_p10, %p774_p8 }
 0x11b   : > { %v392_v7 = vpop.f32.mrf.mxu0 }
 0x11c   : > { %v396_v8 = vadd.f32 %v392_v7, %v316_v6 }
 0x11d   : > { %v603_v9 = vpop.f32.mrf.mxu0 }
 0x11e   : > { %397 = vst.msk [vmem:[#allocation2] sm:$0xff] %vm314_vm0, %v396_v8 }
 0x125   : > { %v401_v11 = vld [vmem:[#allocation2] sm:$0xff] }
 0x126   : > { %v409_v12 = vadd.f32 %v581_v10, %v401_v11 }
 0x128   : > { %410 = vst.msk [vmem:[%s300_s6] sm:$0xff] %vm314_vm0, %v409_v12 }
 0x129   : > { %784 = shalt.err (!%p781_p1)
}
 0x12a   : > { %s785_s9 = scalar_lea.hbm %s427_s17, 128  ;;  %s789_s11 = scalar_lea.hbm %s1186_s3, 512 }
 0x12b   : > { %p786_p6 = scmp.ne.s32.totalorder %s427_s17, %s785_s9  ;;  %p790_p0 = scmp.lt.s32.totalorder %s427_s17, %s1186_s3 }
 0x12c   : > { %p791_p5 = scmp.lt.s32.totalorder %s789_s11, %s785_s9 }
 0x12d   : > { %p787_p9 = pnand %p786_p6, %p1210_p3 }
 0x12e   : > { %p792_p7 = por %p791_p5, %p790_p0 }
 0x12f   : > { %p788_p11 = pneg %p787_p9 }
 0x131   : > { %p793_p4 = pnand %p792_p7, %p788_p11 }
 0x133   : > { %796 = shalt.err (!%p793_p4)
}
 0x134   : > { %608 = dma.vmem_to_hbm [thread:$0]  (%p1210_p3), %s430_s7, 128, %s427_s17, %s412_s18  }
 0x135 PF: > { %p622_p12 = scmp.ge.s32.totalorder %s895_s22, 2  ;;  %s441_s10 = sand.u32 1, %s867_s15  }
 0x136   : > { %p1211_p8 = scmp.ne.s32.totalorder %s1204_s27, 0  ;;  %s442_s23 = scalar_lea.sflag [#allocation5], %s441_s10 }
 0x138   : > { %p618_p13 = pnand %p622_p12, %p1211_p8 }
 0x13a   : > { %p619_p2 = pneg %p618_p13 }
 0x13c   : > { %850 = dma.done.wait (%p619_p2), %s442_s23, 128  }
 0x13d   : > { %852 = vsyncadd (%p619_p2), %s442_s23, 4294967168  ;;  %s22_s22 = sadd.s32 1, %s895_s22   ;;  %s1212_s30 = sld [smem:[#allocation15_spill]] }
 0x13e   : > { %p19_p10 = scmp.ge.s32.totalorder %s22_s22, 6   ;;  %s1213_s6 = sld [smem:[#allocation12_spill]] }
 0x13f   : > { %s1214_s17 = sld [smem:[#allocation16_spill]]  ;;  %s1217_s12 = smov %s859_s13 }
 0x140   : > { %s1215_s7 = sld [smem:[#allocation13_spill]]  ;;  %s1218_s13 = smov %s863_s14 }
 0x141   : > { %s1216_s0 = sld [smem:[#allocation14_spill]]  ;;  %s1220_s15 = smov %s871_s16 }
 0x142   : > { %s1222_s18 = smov %s887_s20  ;;  %s1223_s19 = smov %s891_s21 }
 0x143   : > { %s1219_s14 = smov %s1212_s30  ;;  %21 = sbr.rel (!%p19_p10) target bundleno = 13 (0xd), region = 101 }
 0x144   : > { %s1221_s16 = smov %s1213_s6 }
 0x146   : > { %s1224_s20 = smov %s1215_s7 }
 0x147   : > { %s1225_s21 = smov %s1216_s0 }
 0x148   :  { %447 = vsyncpa [#allocation4], 1 }
 0x149   :  { %449 = vsyncpa [#allocation4 + $0x1], 1 }
 0x14a   :  { %450 = vsyncpa [#allocation7], 1 }
 0x14b   :  { %452 = vsyncpa [#allocation7 + $0x1], 1 }
 0x14c   :  { %453 = vsyncpa [#allocation5], 1 }
 0x14d   :  { %455 = vsyncpa [#allocation5 + $0x1], 1 }

</bundles_post_ra>
